<compile_context>
chip_gen: v7x
topology: tpu7x:2x2x1
jax: 0.10.0
libtpu: 0.0.40
codegen_flags: <defaults>
</compile_context>

<pallas_src>
import jax
import jax.numpy as jnp
from jax.experimental import pallas as pl
from jax.experimental.pallas import tpu as pltpu


def _itm_kernel(x_ref, w_img_ref, txt_ref, w_diff_ref, b_ref, out_ref, acc_ref):
    """One (batch-tile i, F-tile k) grid step of the fused BLIP-ITM head.

    x_ref      : (tm, tk)  flattened image tile, bf16
    w_img_ref  : (tk, D)   image projection weight tile, bf16
    txt_ref    : (tm, D)   per-sample prompt embeddings, f32
    w_diff_ref : (1, D)    w_itm[:,1] - w_itm[:,0], f32
    b_ref      : (1, 1)    b_itm[1] - b_itm[0], f32 scalar in SMEM
    out_ref    : (tm, 1)   softmax(logits)[:, 1]
    acc_ref    : (tm, D)   f32 VMEM accumulator (persists across k)
    """
    k = pl.program_id(1)

    @pl.when(k == 0)
    def _init():
        acc_ref[...] = jnp.zeros_like(acc_ref)

    # image encoder: stream one (tk, D) weight tile, accumulate in f32 on MXU
    acc_ref[...] += jnp.dot(x_ref[...], w_img_ref[...],
                            preferred_element_type=jnp.float32)

    @pl.when(k == pl.num_programs(1) - 1)
    def _finalize():
        img_feat = acc_ref[...]                        # (tm, D) f32
        fused = img_feat * txt_ref[...]                # multimodal fusion (VPU, f32)
        # Folded 2-class ITM head: softmax([l0,l1])[1] == sigmoid(l1 - l0)
        logit = jnp.sum(fused * w_diff_ref[...], axis=1, keepdims=True) + b_ref[0, 0]
        # sigmoid = 1 / (1 + exp(-logit)): exp on EUP, approx reciprocal on EUP
        out_ref[...] = pl.reciprocal(1.0 + jnp.exp(-logit), approx=True)


def _pick_tm(B):
    """Batch tile: multiple of 8 dividing B when possible, else the full batch."""
    if B % 8 != 0:
        return B
    for t in (256, 128, 64, 32, 16, 8):
        if B % t == 0:
            return t
    return B


def _pick_tk(F):
    """F (reduction) tile: largest lane-aligned divisor of F, else full F."""
    for t in (2048, 1024, 512, 256, 128):
        if F % t == 0:
            return t
    return F


def custom_blip_forward(image, refurbished_label, params):
    """image: (B, C, H, W) f32, refurbished_label: (B,) int32. Returns (B,) itm_score."""
    B, C, H, W = image.shape
    F = C * H * W
    D = params["w_img"].shape[1]

    # ---- glue (plain JAX): flatten NCHW + gather prompt embeddings ----
    # TODO(synk): the real BLIP text transformer + tokenizer ("a photo of
    # <class>, <feature>.") has no clean Pallas equivalent; modelled as a
    # deterministic per-class embedding table gathered by the label.
    x_flat = image.reshape(B, F).astype(jnp.bfloat16)            # bf16 activation stream
    w_img = params["w_img"].astype(jnp.bfloat16)                 # bf16 weight stream
    txt_feat = jnp.take(params["prompt_table"], refurbished_label,
                        axis=0).astype(jnp.float32)              # (B, D)

    # Fold the (D, 2) head + softmax into a difference vector + sigmoid.
    w_diff = (params["w_itm"][:, 1] - params["w_itm"][:, 0]
              ).reshape(1, D).astype(jnp.float32)                # (1, D)
    b_diff = (params["b_itm"][0, 1] - params["b_itm"][0, 0]
              ).reshape(1, 1).astype(jnp.float32)                # (1, 1) scalar -> SMEM

    tm = _pick_tm(B)
    tk = _pick_tk(F)
    grid = (B // tm, F // tk)

    out = pl.pallas_call(
        _itm_kernel,
        out_shape=jax.ShapeDtypeStruct((B, 1), jnp.float32),
        grid=grid,
        in_specs=[
            pl.BlockSpec((tm, tk), lambda i, k: (i, k)),   # image tile
            pl.BlockSpec((tk, D), lambda i, k: (k, 0)),    # w_img tile (streamed)
            pl.BlockSpec((tm, D), lambda i, k: (i, 0)),    # prompt embeddings (resident over k)
            pl.BlockSpec((1, D), lambda i, k: (0, 0)),     # folded head weights
            pl.BlockSpec(memory_space=pltpu.MemorySpace.SMEM),  # folded bias scalar
        ],
        out_specs=pl.BlockSpec((tm, 1), lambda i, k: (i, 0)),
        scratch_shapes=[pltpu.VMEM((tm, D), jnp.float32)],
        compiler_params=pltpu.CompilerParams(
            dimension_semantics=("parallel", "arbitrary"),
            vmem_limit_bytes=32 * 1024 * 1024,
        ),
    )(x_flat, w_img, txt_feat, w_diff, b_diff)

    return out[:, 0]  # (B,) itm_score


def _reference_forward(image, refurbished_label, params):
    """Pure-JAX reference (same bf16 casts) for a correctness sanity check."""
    B, C, H, W = image.shape
    F = C * H * W
    x_flat = image.reshape(B, F).astype(jnp.bfloat16)
    w_img = params["w_img"].astype(jnp.bfloat16)
    img_feat = jnp.dot(x_flat, w_img, preferred_element_type=jnp.float32)
    txt_feat = jnp.take(params["prompt_table"], refurbished_label, axis=0)
    fused = img_feat * txt_feat.astype(jnp.float32)
    logits = jnp.dot(fused, params["w_itm"]) + params["b_itm"]
    return jax.nn.softmax(logits, axis=1)[:, 1]


def init_params(key, *, num_classes, C, H, W, D):
    F = C * H * W
    k1, k2, k3, k4 = jax.random.split(key, 4)
    return {
        "w_img": jax.random.normal(k1, (F, D), jnp.float32) * 0.02,
        "prompt_table": jax.random.normal(k2, (num_classes, D), jnp.float32),
        "w_itm": jax.random.normal(k3, (D, 2), jnp.float32) * 0.1,
        "b_itm": jax.random.normal(k4, (1, 2), jnp.float32) * 0.01,
    }


if __name__ == "__main__":
    B, C, H, W = 2, 4, 16, 16
    D = 32
    NUM_CLASSES = 4

    key = jax.random.PRNGKey(0)
    k_img, k_lbl, k_par = jax.random.split(key, 3)

    image = jax.random.normal(k_img, (B, C, H, W), jnp.float32)
    refurbished_label = jax.random.randint(k_lbl, (B,), 0, NUM_CLASSES, jnp.int32)
    params = init_params(k_par, num_classes=NUM_CLASSES, C=C, H=H, W=W, D=D)

    itm_score = custom_blip_forward(image, refurbished_label, params)
    itm_score = jax.block_until_ready(itm_score)

    # sanity: scores are probabilities in (0, 1) of shape (B,)
    assert itm_score.shape == (B,)
    assert bool(jnp.all((itm_score >= 0.0) & (itm_score <= 1.0)))

    # correctness: matches pure-JAX softmax reference (sigmoid folding + approx
    # reciprocal introduce only tiny error)
    ref = jax.block_until_ready(_reference_forward(image, refurbished_label, params))
    assert bool(jnp.all(jnp.abs(itm_score - ref) < 5e-2)), (itm_score, ref)

    print("KERNEL_OK")
</pallas_src>

<mosaic_0001>
module attributes {stable_mosaic.version = 11 : i64} {
  func.func @_itm_kernel(%arg0: i32, %arg1: i32, %arg2: memref<2x1024xbf16, #tpu.memory_space<vmem>>, %arg3: memref<1024x32xbf16, #tpu.memory_space<vmem>>, %arg4: memref<2x32xf32, #tpu.memory_space<vmem>>, %arg5: memref<1x32xf32, #tpu.memory_space<vmem>>, %arg6: memref<1x1xf32, #tpu.memory_space<smem>>, %arg7: memref<2x1xf32, #tpu.memory_space<vmem>>, %arg8: memref<2x32xf32, #tpu.memory_space<vmem>>) attributes {dimension_semantics = [#tpu.dimension_semantics<parallel>, #tpu.dimension_semantics<arbitrary>], iteration_bounds = array<i64: 1, 1>, scalar_prefetch = 0 : i64, scratch_operands = 1 : i64, tpu.core_type = #tpu.core_type<tc>, window_params = [{transform_indices = @transform_0, window_bounds = array<i64: 2, 1024>}, {transform_indices = @transform_1, window_bounds = array<i64: 1024, 32>}, {transform_indices = @transform_2, window_bounds = array<i64: 2, 32>}, {pipeline_mode = #tpu.pipeline_mode<synchronous>, transform_indices = @transform_3, window_bounds = array<i64: 1, 32>}, {transform_indices = @transform_4, window_bounds = array<i64: 1, 1>}, {transform_indices = @transform_5, window_bounds = array<i64: 2, 1>}]} {
    %c0_i32 = arith.constant 0 : i32
    %0 = arith.cmpi eq, %arg1, %c0_i32 : i32
    %1 = arith.extui %0 : i1 to i32
    %c0_i32_0 = arith.constant 0 : i32
    %2 = arith.cmpi ne, %1, %c0_i32_0 : i32
    scf.if %2 {
      %cst_10 = arith.constant 0.000000e+00 : f32
      %12 = vector.broadcast %cst_10 : f32 to vector<2x32xf32>
      %c0_11 = arith.constant 0 : index
      %c0_12 = arith.constant 0 : index
      %13 = vector.load %arg8[%c0_11, %c0_12] : memref<2x32xf32, #tpu.memory_space<vmem>>, vector<2x32xf32>
      tpu.vector_store %arg8[%c0_11, %c0_12], %12 {strides = array<i32>} : memref<2x32xf32, #tpu.memory_space<vmem>>, vector<2x32xf32>,
    } else {
    }
    %c0 = arith.constant 0 : index
    %c0_1 = arith.constant 0 : index
    %3 = vector.load %arg8[%c0, %c0_1] : memref<2x32xf32, #tpu.memory_space<vmem>>, vector<2x32xf32>
    %c0_2 = arith.constant 0 : index
    %c0_3 = arith.constant 0 : index
    %4 = vector.load %arg2[%c0_2, %c0_3] : memref<2x1024xbf16, #tpu.memory_space<vmem>>, vector<2x1024xbf16>
    %c0_4 = arith.constant 0 : index
    %c0_5 = arith.constant 0 : index
    %5 = vector.load %arg3[%c0_4, %c0_5] : memref<1024x32xbf16, #tpu.memory_space<vmem>>, vector<1024x32xbf16>
    %cst = arith.constant dense<0.000000e+00> : vector<2x32xf32>
    %6 = tpu.matmul %4, %5, %cst {dimension_numbers = #tpu.dot_dimension_numbers<[1], [0], [0], [1], [0, 0, 1, 1], [], []>} : vector<2x1024xbf16>, vector<1024x32xbf16>, vector<2x32xf32> -> vector<2x32xf32>
    %7 = arith.addf %3, %6 : vector<2x32xf32>
    %c0_6 = arith.constant 0 : index
    %c0_7 = arith.constant 0 : index
    %8 = vector.load %arg8[%c0_6, %c0_7] : memref<2x32xf32, #tpu.memory_space<vmem>>, vector<2x32xf32>
    tpu.vector_store %arg8[%c0_6, %c0_7], %7 {strides = array<i32>} : memref<2x32xf32, #tpu.memory_space<vmem>>, vector<2x32xf32>,
    %c0_i32_8 = arith.constant 0 : i32
    %9 = arith.cmpi eq, %arg1, %c0_i32_8 : i32
    %10 = arith.extui %9 : i1 to i32
    %c0_i32_9 = arith.constant 0 : i32
    %11 = arith.cmpi ne, %10, %c0_i32_9 : i32
    scf.if %11 {
      %c0_10 = arith.constant 0 : index
      %c0_11 = arith.constant 0 : index
      %12 = vector.load %arg8[%c0_10, %c0_11] : memref<2x32xf32, #tpu.memory_space<vmem>>, vector<2x32xf32>
      %c0_12 = arith.constant 0 : index
      %c0_13 = arith.constant 0 : index
      %13 = vector.load %arg4[%c0_12, %c0_13] : memref<2x32xf32, #tpu.memory_space<vmem>>, vector<2x32xf32>
      %14 = arith.mulf %12, %13 : vector<2x32xf32>
      %c0_14 = arith.constant 0 : index
      %c0_15 = arith.constant 0 : index
      %15 = vector.load %arg5[%c0_14, %c0_15] : memref<1x32xf32, #tpu.memory_space<vmem>>, vector<1x32xf32>
      %16 = vector.broadcast %15 : vector<1x32xf32> to vector<2x32xf32>
      %17 = arith.mulf %14, %16 : vector<2x32xf32>
      %cst_16 = arith.constant dense<0.000000e+00> : vector<2xf32>
      %18 = vector.multi_reduction <add>, %17, %cst_16 [1] : vector<2x32xf32> to vector<2xf32>
      %19 = vector.shape_cast %18 : vector<2xf32> to vector<2x1xf32>
      %c0_17 = arith.constant 0 : index
      %c0_18 = arith.constant 0 : index
      %20 = memref.load %arg6[%c0_17, %c0_18] : memref<1x1xf32, #tpu.memory_space<smem>>
      %21 = vector.broadcast %20 : f32 to vector<2x1xf32>
      %22 = arith.addf %19, %21 : vector<2x1xf32>
      %cst_19 = arith.constant 0.000000e+00 : f32
      %23 = vector.broadcast %cst_19 : f32 to vector<2x1xf32>
      %24 = arith.subf %23, %22 : vector<2x1xf32>
      %25 = math.exp %24 : vector<2x1xf32>
      %cst_20 = arith.constant 1.000000e+00 : f32
      %26 = vector.broadcast %cst_20 : f32 to vector<2x1xf32>
      %27 = arith.addf %26, %25 : vector<2x1xf32>
      %28 = tpu.reciprocal %27 {approx = true} : vector<2x1xf32> -> vector<2x1xf32>
      %c0_21 = arith.constant 0 : index
      %c0_22 = arith.constant 0 : index
      %29 = vector.load %arg7[%c0_21, %c0_22] : memref<2x1xf32, #tpu.memory_space<vmem>>, vector<2x1xf32>
      tpu.vector_store %arg7[%c0_21, %c0_22], %28 {strides = array<i32>} : memref<2x1xf32, #tpu.memory_space<vmem>>, vector<2x1xf32>,
    } else {
    }
    return
  }
  func.func @transform_0(%arg0: i32, %arg1: i32) -> (i32, i32) {
    %c0_i32 = arith.constant 0 : i32
    return %arg0, %arg1 : i32, i32
  }
  func.func @transform_1(%arg0: i32, %arg1: i32) -> (i32, i32) {
    %c0_i32 = arith.constant 0 : i32
    %c0_i32_0 = arith.constant 0 : i32
    return %arg1, %c0_i32 : i32, i32
  }
  func.func @transform_2(%arg0: i32, %arg1: i32) -> (i32, i32) {
    %c0_i32 = arith.constant 0 : i32
    %c0_i32_0 = arith.constant 0 : i32
    return %arg0, %c0_i32 : i32, i32
  }
  func.func @transform_3(%arg0: i32, %arg1: i32) -> (i32, i32) {
    %c0_i32 = arith.constant 0 : i32
    %c0_i32_0 = arith.constant 0 : i32
    %c0_i32_1 = arith.constant 0 : i32
    return %c0_i32, %c0_i32_0 : i32, i32
  }
  func.func @transform_4(%arg0: i32, %arg1: i32) -> (i32, i32) {
    %c0_i32 = arith.constant 0 : i32
    %c0_i32_0 = arith.constant 0 : i32
    %c0_i32_1 = arith.constant 0 : i32
    return %c0_i32, %c0_i32_0 : i32, i32
  }
  func.func @transform_5(%arg0: i32, %arg1: i32) -> (i32, i32) {
    %c0_i32 = arith.constant 0 : i32
    %c0_i32_0 = arith.constant 0 : i32
    return %arg0, %c0_i32 : i32, i32
  }
}

</mosaic_0001>

<bundles_post_ra>
// kernel: tpu_custom_call.1
= control target key start
LH: loop header
LB: loop body
LE: loop exit
PB: predicated region body
PF: predicated region fallthrough
CT: control target
= control target key end

     0   :  { %v1018_v22 = vmov 1966171168   ;;  %v163_v24 = vlaneseq  ;;  %vm26_vm0 = vcmask 254976   ;;  %vm788_vm1 = vcmask 1024   ;;  %s1273_s1 = inlined_call_operand.vmem [shape: bf16[1024,32], index: 1, kind: input, shape index: {}]   ;;  %s1274_s0 = inlined_call_operand.vmem [shape: bf16[2,1024], index: 0, kind: input, shape index: {}]   ;;  %s1275_s2 = inlined_call_operand.vmem [shape: f32[2,32], index: 2, kind: input, shape index: {}]   ;;  %s1276_s3 = inlined_call_operand.vmem [shape: f32[1,32], index: 3, kind: input, shape index: {}]   ;;  %s1277_s4 = inlined_call_operand.<no memory space> [shape: f32[1,1], index: 4, kind: input, shape index: {}]   ;;  %s1278_s5 = inlined_call_operand.vmem [shape: f32[2,1], index: 5, kind: output, shape index: {}]  }
   0x1   :  { %v949_v0 = vld [vmem:[%s1273_s1 + $0x40] sm:$0xff]   ;;  %v953_v4 = vld [vmem:[%s1273_s1 + $0x48] sm:$0xff]   ;;  %v957_v8 = vld [vmem:[%s1273_s1 + $0x50] sm:$0xff]   ;;  %v161_v23 = vunpack.c.l.s4 %v1018_v22 }
   0x2   :  { %v950_v1 = vld [vmem:[%s1273_s1 + $0xc0] sm:$0xff]   ;;  %859 = vmatprep.subr.bf16.mxu0 %v949_v0  ;;  %v954_v5 = vld [vmem:[%s1273_s1 + $0xc8] sm:$0xff]   ;;  %v958_v9 = vld [vmem:[%s1273_s1 + $0xd0] sm:$0xff]   ;;  %v164_v30 = vshrl.u32 %v163_v24, 7 }
   0x3   :  { %v951_v2 = vld [vmem:[%s1273_s1] sm:$0xff]   ;;  %881 = vmatprep.subr.bf16.mxu1 %v950_v1  ;;  %v955_v6 = vld [vmem:[%s1273_s1 + $0x8] sm:$0xff]   ;;  %v959_v10 = vld [vmem:[%s1273_s1 + $0x10] sm:$0xff]   ;;  %v162_v29 = vunpack.c.0.s8 %v161_v23 }
   0x4   :  { %v952_v3 = vld [vmem:[%s1273_s1 + $0x80] sm:$0xff]   ;;  %860 = vmatpush3.bf16.msra.mxu0 %v951_v2  ;;  %v956_v7 = vld [vmem:[%s1273_s1 + $0x88] sm:$0xff]   ;;  %v960_v11 = vld [vmem:[%s1273_s1 + $0x90] sm:$0xff]  }
   0x5   :  { %882 = vmatpush3.bf16.msra.mxu1 %v952_v3  ;;  %861 = vmatprep.subr.bf16.mxu0 %v953_v4  ;;  %v961_v12 = vld [vmem:[%s1273_s1 + $0x58] sm:$0xff]   ;;  %v965_v16 = vld [vmem:[%s1273_s1 + $0x60] sm:$0xff]   ;;  %v969_v20 = vld [vmem:[%s1273_s1 + $0x68] sm:$0xff]   ;;  %v1140_v35 = vsub.s32 %v162_v29, %v164_v30 }
   0x6   :  { %883 = vmatprep.subr.bf16.mxu1 %v954_v5  ;;  %v962_v13 = vld [vmem:[%s1273_s1 + $0xd8] sm:$0xff]   ;;  %v966_v17 = vld [vmem:[%s1273_s1 + $0xe0] sm:$0xff]   ;;  %v970_v21 = vld [vmem:[%s1273_s1 + $0xe8] sm:$0xff]  }
   0x7   :  { %v963_v14 = vld [vmem:[%s1273_s1 + $0x18] sm:$0xff]   ;;  %v967_v18 = vld [vmem:[%s1273_s1 + $0x20] sm:$0xff]   ;;  %v971_v25 = vld [vmem:[%s1273_s1 + $0x28] sm:$0xff]  }
   0x8   :  { %862 = vmatpush3.bf16.msra.mxu0 %v955_v6  ;;  %v964_v15 = vld [vmem:[%s1273_s1 + $0x98] sm:$0xff]   ;;  %v968_v19 = vld [vmem:[%s1273_s1 + $0xa0] sm:$0xff]   ;;  %v972_v26 = vld [vmem:[%s1273_s1 + $0xa8] sm:$0xff]  }
   0x9   :  { %884 = vmatpush3.bf16.msra.mxu1 %v956_v7  ;;  %863 = vmatprep.subr.bf16.mxu0 %v957_v8  ;;  %v973_v27 = vld [vmem:[%s1273_s1 + $0x70] sm:$0xff]   ;;  %v977_v33 = vld [vmem:[%s1273_s1 + $0x78] sm:$0xff]   ;;  %v29_v38 = vld [vmem:[%s1274_s0] sm:$0xff] }
   0xa   :  { %885 = vmatprep.subr.bf16.mxu1 %v958_v9  ;;  %v974_v28 = vld [vmem:[%s1273_s1 + $0xf0] sm:$0xff]   ;;  %v978_v34 = vld [vmem:[%s1273_s1 + $0xf8] sm:$0xff]   ;;  %v159_v39 = vcombine.high %v29_v38, %v29_v38  ;;  %v166_v40 = vrot.slane %v29_v38, %v1140_v35  ;;  %v982_v41 = vld [vmem:[%s1273_s1 + $0x140] sm:$0xff]  }
   0xb   :  { %v975_v31 = vld [vmem:[%s1273_s1 + $0x30] sm:$0xff]   ;;  %v979_v36 = vld [vmem:[%s1273_s1 + $0x38] sm:$0xff]   ;;  %v983_v42 = vld [vmem:[%s1273_s1 + $0x1c0] sm:$0xff]  }
   0xc   :  { %864 = vmatpush3.bf16.msra.mxu0 %v959_v10  ;;  %v976_v32 = vld [vmem:[%s1273_s1 + $0xb0] sm:$0xff]   ;;  %v980_v37 = vld [vmem:[%s1273_s1 + $0xb8] sm:$0xff]   ;;  %v174_v43 = vcombine.high %v166_v40, %v166_v40  ;;  %v182_v44 = vrot.slane %v166_v40, %v1140_v35  ;;  %v1160_v45 = vrot.slane %v159_v39, %v1140_v35  ;;  %v984_v47 = vld [vmem:[%s1273_s1 + $0x100] sm:$0xff]  }
   0xd   :  { %886 = vmatpush3.bf16.msra.mxu1 %v960_v11  ;;  %865 = vmatprep.subr.bf16.mxu0 %v961_v12  ;;  %v986_v50 = vld [vmem:[%s1273_s1 + $0x148] sm:$0xff]   ;;  %v985_v52 = vld [vmem:[%s1273_s1 + $0x180] sm:$0xff]   ;;  %v990_v57 = vld [vmem:[%s1273_s1 + $0x150] sm:$0xff]  }
   0xe   :  { %887 = vmatprep.subr.bf16.mxu1 %v962_v13  ;;  %v196_v46 = vrot.slane %v174_v43, %v1140_v35  ;;  %v175_v48 = vcombine.high %v1160_v45, %v1160_v45  ;;  %v204_v49 = vcombine.high %v182_v44, %v182_v44  ;;  %v987_v54 = vld [vmem:[%s1273_s1 + $0x1c8] sm:$0xff]   ;;  %v991_v59 = vld [vmem:[%s1273_s1 + $0x1d0] sm:$0xff]   ;;  %v994_v61 = vld [vmem:[%s1273_s1 + $0x158] sm:$0xff]  }
   0xf   :  { %v988_v55 = vld [vmem:[%s1273_s1 + $0x108] sm:$0xff]   ;;  %v992_v60 = vld [vmem:[%s1273_s1 + $0x110] sm:$0xff]   ;;  %v995_v63 = vld [vmem:[%s1273_s1 + $0x1d8] sm:$0xff]  }
  0x10   :  { %866 = vmatpush3.bf16.msra.mxu0 %v963_v14  ;;  %632 = vmatprep.mubr.bf16.mxu0 %v196_v46  ;;  %v206_v51 = vcombine.high %v196_v46, %v196_v46  ;;  %v203_v53 = vrot.slane %v175_v48, %v1140_v35  ;;  %v989_v58 = vld [vmem:[%s1273_s1 + $0x188] sm:$0xff]   ;;  %v993_v62 = vld [vmem:[%s1273_s1 + $0x190] sm:$0xff]   ;;  %v996_v0 = vld [vmem:[%s1273_s1 + $0x118] sm:$0xff]  }
  0x11   :  { %888 = vmatpush3.bf16.msra.mxu1 %v964_v15  ;;  %867 = vmatprep.subr.bf16.mxu0 %v965_v16  ;;  %v998_v1 = vld [vmem:[%s1273_s1 + $0x160] sm:$0xff]   ;;  %v997_v2 = vld [vmem:[%s1273_s1 + $0x198] sm:$0xff]   ;;  %v1002_v5 = vld [vmem:[%s1273_s1 + $0x168] sm:$0xff]  }
  0x12   :  { %889 = vmatprep.subr.bf16.mxu1 %v966_v17  ;;  %672 = vmatprep.mubr.bf16.mxu1 %v206_v51  ;;  %v207_v56 = vcombine.high %v203_v53, %v203_v53  ;;  %v999_v3 = vld [vmem:[%s1273_s1 + $0x1e0] sm:$0xff]   ;;  %v1003_v7 = vld [vmem:[%s1273_s1 + $0x1e8] sm:$0xff]   ;;  %v1006_v9 = vld [vmem:[%s1273_s1 + $0x170] sm:$0xff]   ;;  %v189_v17 = vrot.slane %v1160_v45, %v1140_v35 }
  0x13   :  { %v1000_v4 = vld [vmem:[%s1273_s1 + $0x120] sm:$0xff]   ;;  %v1004_v8 = vld [vmem:[%s1273_s1 + $0x128] sm:$0xff]   ;;  %v1007_v11 = vld [vmem:[%s1273_s1 + $0x1f0] sm:$0xff]  }
  0x14   :  { %868 = vmatpush3.bf16.msra.mxu0 %v967_v18  ;;  %v1001_v6 = vld [vmem:[%s1273_s1 + $0x1a0] sm:$0xff]   ;;  %v1005_v10 = vld [vmem:[%s1273_s1 + $0x1a8] sm:$0xff]   ;;  %v1008_v12 = vld [vmem:[%s1273_s1 + $0x130] sm:$0xff]  }
  0x15   :  { %890 = vmatpush3.bf16.msra.mxu1 %v968_v19  ;;  %869 = vmatprep.subr.bf16.mxu0 %v969_v20  ;;  %v1010_v13 = vld [vmem:[%s1273_s1 + $0x178] sm:$0xff]   ;;  %v1009_v14 = vld [vmem:[%s1273_s1 + $0x1b0] sm:$0xff]   ;;  %v205_v19 = vcombine.high %v189_v17, %v189_v17  ;;  %v1019_v20 = vmov 0.0   ;;  %v767_v46 = vld [vmem:[%s1275_s2] sm:$0x3] }
  0x16   :  { %891 = vmatprep.subr.bf16.mxu1 %v970_v21  ;;  %v1011_v15 = vld [vmem:[%s1273_s1 + $0x1f8] sm:$0xff]   ;;  %27 = vst.msk [vmem:[#allocation2] sm:$0x3] %vm26_vm0, %v1019_v20  ;;  %v858_v48 = vld [vmem:[%s1276_s3] ss:$0 sm:$0xff] }
  0x17   :  { %v1012_v16 = vld [vmem:[%s1273_s1 + $0x138] sm:$0xff]  }
  0x18   :  { %870 = vmatpush3.bf16.msra.mxu0 %v971_v25  ;;  %v1013_v18 = vld [vmem:[%s1273_s1 + $0x1b8] sm:$0xff]  }
  0x19   :  { %892 = vmatpush3.bf16.msra.mxu1 %v972_v26  ;;  %871 = vmatprep.subr.bf16.mxu0 %v973_v27 }
  0x1a   :  { %893 = vmatprep.subr.bf16.mxu1 %v974_v28 }
  0x1c   :  { %872 = vmatpush3.bf16.msra.mxu0 %v975_v31 }
  0x1d   :  { %894 = vmatpush3.bf16.msra.mxu1 %v976_v32  ;;  %873 = vmatprep.subr.bf16.mxu0 %v977_v33  ;;  %v28_v43 = vld [vmem:[#allocation2] sm:$0x3] }
  0x1e   :  { %895 = vmatprep.subr.bf16.mxu1 %v978_v34 }
  0x20   :  { %874 = vmatpush3.bf16.msra.mxu0 %v979_v36 }
  0x21   :  { %896 = vmatpush3.bf16.msra.mxu1 %v980_v37  ;;  %903 = vmatprep.subr.bf16.mxu0 %v982_v41 }
  0x22   :  { %925 = vmatprep.subr.bf16.mxu1 %v983_v42 }
  0x23   :  { %633 = vmatmul.mubr.bf16.vlgmr.msra.gmra.mrb[0].mxu0 %v182_v44 }
  0x24   :  { %904 = vmatpush3.bf16.msra.mxu0 %v984_v47  ;;  %673 = vmatmul.mubr.bf16.vlgmr.msra.gmra.mrb[0].mxu1 %v204_v49 }
  0x25   :  { %905 = vmatprep.subr.bf16.mxu0 %v986_v50  ;;  %926 = vmatpush3.bf16.msra.mxu1 %v985_v52  ;;  %v781_v52 = vstv %s1277_s4 }
  0x26   :  { %712 = vmatprep.mubr.bf16.mxu0 %v203_v53  ;;  %927 = vmatprep.subr.bf16.mxu1 %v987_v54 }
  0x27   :  { %752 = vmatprep.mubr.bf16.mxu1 %v207_v56 }
  0x28   :  { %906 = vmatpush3.bf16.msra.mxu0 %v988_v55 }
  0x29   :  { %907 = vmatprep.subr.bf16.mxu0 %v990_v57  ;;  %928 = vmatpush3.bf16.msra.mxu1 %v989_v58 }
  0x2a   :  { %929 = vmatprep.subr.bf16.mxu1 %v991_v59 }
  0x2c   :  { %908 = vmatpush3.bf16.msra.mxu0 %v992_v60 }
  0x2d   :  { %909 = vmatprep.subr.bf16.mxu0 %v994_v61  ;;  %930 = vmatpush3.bf16.msra.mxu1 %v993_v62 }
  0x2e   :  { %931 = vmatprep.subr.bf16.mxu1 %v995_v63 }
  0x30   :  { %910 = vmatpush3.bf16.msra.mxu0 %v996_v0 }
  0x31   :  { %911 = vmatprep.subr.bf16.mxu0 %v998_v1  ;;  %932 = vmatpush3.bf16.msra.mxu1 %v997_v2 }
  0x32   :  { %933 = vmatprep.subr.bf16.mxu1 %v999_v3 }
  0x34   :  { %912 = vmatpush3.bf16.msra.mxu0 %v1000_v4 }
  0x35   :  { %913 = vmatprep.subr.bf16.mxu0 %v1002_v5  ;;  %934 = vmatpush3.bf16.msra.mxu1 %v1001_v6 }
  0x36   :  { %935 = vmatprep.subr.bf16.mxu1 %v1003_v7 }
  0x38   :  { %914 = vmatpush3.bf16.msra.mxu0 %v1004_v8 }
  0x39   :  { %915 = vmatprep.subr.bf16.mxu0 %v1006_v9  ;;  %936 = vmatpush3.bf16.msra.mxu1 %v1005_v10 }
  0x3a   :  { %937 = vmatprep.subr.bf16.mxu1 %v1007_v11 }
  0x3c   :  { %916 = vmatpush3.bf16.msra.mxu0 %v1008_v12 }
  0x3d   :  { %917 = vmatprep.subr.bf16.mxu0 %v1010_v13  ;;  %938 = vmatpush3.bf16.msra.mxu1 %v1009_v14 }
  0x3e   :  { %939 = vmatprep.subr.bf16.mxu1 %v1011_v15 }
  0x40   :  { %918 = vmatpush3.bf16.msra.mxu0 %v1012_v16 }
  0x41   :  { %940 = vmatpush3.bf16.msra.mxu1 %v1013_v18 }
  0x43   :  { %713 = vmatmul.mubr.bf16.vlgmr.msra.gmra.mrb[4].mxu0 %v189_v17 }
  0x44   :  { %753 = vmatmul.mubr.bf16.vlgmr.msra.gmra.mrb[4].mxu1 %v205_v19 }
  0xf6   :  { %v875_v21 = vpop.f32.mrb[0].mxu0 }
  0xf7   :  { %v876_v22 = vpop.f32.mrb[1].mxu0  ;;  %v897_v23 = vpop.f32.mrb[0].mxu1 }
  0xf8   :  { %v877_v24 = vadd.f32 %v876_v22, %v875_v21  ;;  %v878_v25 = vpop.f32.mrb[2].mxu0  ;;  %v898_v26 = vpop.f32.mrb[1].mxu1 }
  0xf9   :  { %v879_v27 = vpop.f32.mrb[3].mxu0  ;;  %v899_v28 = vadd.f32 %v898_v26, %v897_v23  ;;  %v900_v29 = vpop.f32.mrb[2].mxu1 }
  0xfa   :  { %v901_v30 = vpop.f32.mrb[3].mxu1 }
  0xfb   :  { %v675_v31 = vadd.f32 %v899_v28, %v877_v24 }
 0x116   :  { %v919_v32 = vpop.f32.mrb[4].mxu0 }
 0x117   :  { %v920_v33 = vpop.f32.mrb[5].mxu0  ;;  %v941_v34 = vpop.f32.mrb[4].mxu1 }
 0x118   :  { %v921_v35 = vadd.f32 %v920_v33, %v919_v32  ;;  %v922_v36 = vpop.f32.mrb[6].mxu0  ;;  %v942_v37 = vpop.f32.mrb[5].mxu1 }
 0x119   :  { %v923_v38 = vpop.f32.mrb[7].mxu0  ;;  %v943_v40 = vadd.f32 %v942_v37, %v941_v34  ;;  %v944_v41 = vpop.f32.mrb[6].mxu1 }
 0x11a   :  { %v715_v39 = vadd.f32 %v921_v35, %v675_v31  ;;  %v945_v42 = vpop.f32.mrb[7].mxu1 }
 0x11c   :  { %v755_v44 = vadd.f32 %v943_v40, %v715_v39 }
 0x11e   :  { %v760_v45 = vadd.f32 %v755_v44, %v28_v43 }
 0x120   :  { %762 = vst.msk [vmem:[#allocation2] sm:$0x3] %vm26_vm0, %v760_v45 }
 0x127   :  { %v766_v47 = vld [vmem:[#allocation2] sm:$0x3] }
 0x128   :  { %v768_v49 = vmul.f32 %v767_v46, %v766_v47 }
 0x12a   :  { %v776_v50 = vmul.f32 %v858_v48, %v768_v49 }
 0x12c   :  { %v777_v51 = vsel %vm26_vm0, %v776_v50, 0.0 }
 0x12d   :  { %778 = vadd.xlane.f32.xlu0 %v777_v51 }
 0x1ba   :  { %v779_v53 = vpop.xlane.xlu0 %778 }
 0x1bb   :  { %v782_v54 = vadd.f32 %v781_v52, %v779_v53 }
 0x1bd   :  { %v783_v55 = vsub.f32 0.0, %v782_v54 }
 0x1bf   :  { %v784_v56 = vmul.f32 1.442695, %v783_v55 }
 0x1c1   :  { %1014 = vpow2.f32 %v784_v56 }
 0x1cb   :  { %v1015_v57 = vpop.eup %1014 }
 0x1cc   :  { %v786_v58 = vadd.f32 1.0, %v1015_v57 }
 0x1ce   :  { %1016 = vrcp.f32 %v786_v58 }
 0x1d8   :  { %v1017_v59 = vpop.eup %1016 }
 0x1d9   :  { %789 = vst.msk [vmem:[%s1278_s5] sm:$0x3] %vm788_vm1, %v1017_v59 }

</bundles_post_ra>
